<compile_context>
chip_gen: v6e
topology: v6e:2x2x1
jax: 0.10.0
libtpu: 0.0.40
codegen_flags: <defaults>
</compile_context>

<pallas_src>
import functools

import jax
import jax.numpy as jnp
from jax.experimental import pallas as pl
from jax.experimental.pallas import tpu as pltpu

_LANES = 128


def _hardtanh_kernel(x_ref, o_ref, *, min_val, max_val):
    # Pure VPU elementwise clamp; min_val/max_val are Python-float literals.
    o_ref[...] = jnp.clip(x_ref[...], min_val, max_val)


def _min_sublanes(dtype) -> int:
    # Sub-32-bit dtypes pack along sublanes: f32 -> 8, bf16/f16 -> 16, int8/fp8 -> 32.
    itemsize = jnp.dtype(dtype).itemsize
    return max(8, 32 // max(itemsize, 1))


def hardtanh(x, min_val=-1.0, max_val=1.0):
    """Elementwise clamp via a Pallas TPU kernel. Preserves shape and dtype."""
    orig_shape = x.shape
    dtype = x.dtype
    n = x.size
    if n == 0:
        return x

    kernel = functools.partial(
        _hardtanh_kernel, min_val=float(min_val), max_val=float(max_val)
    )

    sub = _min_sublanes(dtype)
    itemsize = jnp.dtype(dtype).itemsize

    # Flatten to a lane-dense (rows, 128) slab. Only pad when the element
    # count is not already a multiple of the (sub, 128) tile; the pad/slice
    # round-trip is pure extra HBM traffic otherwise.
    tile_elems = sub * _LANES
    n_pad = pl.cdiv(n, tile_elems) * tile_elems
    padded = n_pad != n
    x_flat = jnp.reshape(x, (-1,))
    if padded:
        x_flat = jnp.pad(x_flat, (0, n_pad - n))
    rows = n_pad // _LANES
    x2d = jnp.reshape(x_flat, (rows, _LANES))

    # Target ~2 MiB per block: large enough to sit near the HBM-bandwidth
    # roofline for big inputs, small enough that double-buffered in+out
    # (4 x block bytes ≈ 8 MiB) fits the scoped-VMEM defaults on v5e/v6e/v7x,
    # and small enough that large inputs still yield >=2 grid steps for v7x's
    # two TensorCores via the "parallel" dimension semantics.
    target_bytes = 2 * 1024 * 1024
    row_tile = max(sub, (target_bytes // (_LANES * itemsize)) // sub * sub)
    row_tile = min(row_tile, rows)  # rows is always a multiple of `sub`
    grid = (pl.cdiv(rows, row_tile),)

    out = pl.pallas_call(
        kernel,
        out_shape=jax.ShapeDtypeStruct((rows, _LANES), dtype),
        grid_spec=pltpu.PrefetchScalarGridSpec(
            num_scalar_prefetch=0,
            grid=grid,
            in_specs=[pl.BlockSpec((row_tile, _LANES), lambda i: (i, 0))],
            out_specs=pl.BlockSpec((row_tile, _LANES), lambda i: (i, 0)),
        ),
        compiler_params=pltpu.CompilerParams(
            dimension_semantics=("parallel",),
        ),
    )(x2d)

    out_flat = jnp.reshape(out, (-1,))
    if padded:
        out_flat = out_flat[:n]
    return jnp.reshape(out_flat, orig_shape)


class MyHardTanh:
    """JAX/Pallas equivalent of the PyTorch MyHardTanh module (forward only)."""

    # TODO(synk): backward pass (grad * (min<=x<=max)) not implemented; forward only.

    def __init__(self, min_val=-1.0, max_val=1.0):
        self.min_val = min_val
        self.max_val = max_val

    def __call__(self, x):
        return hardtanh(x, self.min_val, self.max_val)


if __name__ == "__main__":
    key = jax.random.PRNGKey(0)
    # NCHW input, small shape consistent with the module's test usage.
    x = jax.random.normal(key, (2, 4, 16, 16), dtype=jnp.float32) * 2.0

    module = MyHardTanh(min_val=-1.0, max_val=1.0)
    y = module(x)
    y = jax.block_until_ready(y)

    # Correctness check against plain-JAX reference.
    y_ref = jnp.clip(x, -1.0, 1.0)
    assert y.shape == x.shape and y.dtype == x.dtype
    assert jnp.allclose(y, y_ref), "mismatch vs reference clamp"

    print("KERNEL_OK")
</pallas_src>

<mosaic_0001>
module attributes {stable_mosaic.version = 11 : i64} {
  func.func @_hardtanh_kernel(%arg0: i32, %arg1: memref<16x128xf32, #tpu.memory_space<vmem>>, %arg2: memref<16x128xf32, #tpu.memory_space<vmem>>) attributes {dimension_semantics = [#tpu.dimension_semantics<parallel>], iteration_bounds = array<i64: 1>, scalar_prefetch = 0 : i64, scratch_operands = 0 : i64, tpu.core_type = #tpu.core_type<tc>, window_params = [{transform_indices = @transform_0, window_bounds = array<i64: 16, 128>}, {transform_indices = @transform_1, window_bounds = array<i64: 16, 128>}]} {
    %c0 = arith.constant 0 : index
    %c0_0 = arith.constant 0 : index
    %0 = vector.load %arg1[%c0, %c0_0] : memref<16x128xf32, #tpu.memory_space<vmem>>, vector<16x128xf32>
    %cst = arith.constant -1.000000e+00 : f32
    %cst_1 = arith.constant 1.000000e+00 : f32
    %1 = vector.broadcast %cst : f32 to vector<16x128xf32>
    %2 = arith.maximumf %1, %0 : vector<16x128xf32>
    %3 = vector.broadcast %cst_1 : f32 to vector<16x128xf32>
    %4 = arith.minimumf %3, %2 : vector<16x128xf32>
    %c0_2 = arith.constant 0 : index
    %c0_3 = arith.constant 0 : index
    %5 = vector.load %arg2[%c0_2, %c0_3] : memref<16x128xf32, #tpu.memory_space<vmem>>, vector<16x128xf32>
    tpu.vector_store %arg2[%c0_2, %c0_3], %4 {strides = array<i32>} : memref<16x128xf32, #tpu.memory_space<vmem>>, vector<16x128xf32>,
    return
  }
  func.func @transform_0(%arg0: i32) -> (i32, i32) {
    %c0_i32 = arith.constant 0 : i32
    %c0_i32_0 = arith.constant 0 : i32
    return %arg0, %c0_i32 : i32, i32
  }
  func.func @transform_1(%arg0: i32) -> (i32, i32) {
    %c0_i32 = arith.constant 0 : i32
    %c0_i32_0 = arith.constant 0 : i32
    return %arg0, %c0_i32 : i32, i32
  }
}

</mosaic_0001>

<bundles_post_ra>
// kernel: tpu_custom_call.1
= control target key start
LH: loop header
LB: loop body
LE: loop exit
PB: predicated region body
PF: predicated region fallthrough
CT: control target
= control target key end

     0   :  { %6 = vsyncpa [#allocation3], 0  ;;  %s118_s0 = inlined_call_operand.hbm [shape: f32[16,128], index: 0, kind: input, shape index: {}]   ;;  %s119_s1 = inlined_call_operand.hbm [shape: f32[16,128], index: 1, kind: output, shape index: {}]  }
   0x1   :  { %7 = vsyncpa [#allocation4], 0  ;;  %s98_s6 = smov [#allocation2]  }
   0x2   :  { %s13_s7 = sshll.u32 %s98_s6, 4  ;;  %s14_s7 = int_to_ptr.vmem [resolvable:$true] %s13_s7 }
   0x3   :  { %s62_s8 = scalar_lea.vmem %s14_s7, 256  ;;  %p67_p1 = scmp.lt.s32.totalorder %s14_s7, %s14_s7 }
   0x4   :  { %p63_p0 = scmp.ne.s32.totalorder %s14_s7, %s62_s8  ;;  %p68_p2 = scmp.lt.s32.totalorder %s62_s8, %s62_s8 }
   0x6   :  { %p69_p3 = por %p68_p2, %p67_p1 }
   0x8   :  { %p70_p4 = pnand %p69_p3, %p63_p0 }
   0xa   :  { %73 = shalt.err (!%p70_p4)
}
   0xb   :  { %s99_s9 = smov 128   ;;  %s100_s10 = smov 8  }
   0xc   :  { %19 = dma.hbm_to_vmem [thread:$0]  %s118_s0, 256, %s14_s7, [#allocation3], %s99_s9, %s99_s9, %s100_s10  }
   0xd   :  { %94 = dma.done.wait [#allocation3], 256  }
   0xe   :  { %95 = vsyncadd [#allocation3], 4294967040  ;;  %s101_s13 = smov [#allocation5]   ;;  %v23_v0 = vld [vmem:[#allocation2] sm:$0xff]  ;;  %v24_v1 = vld [vmem:[#allocation2 + $0x8] sm:$0xff] }
   0xf   :  { %s36_s14 = sshll.u32 %s101_s13, 4  ;;  %v48_v2 = vclamps-f32 %v23_v0, 1.0  ;;  %v49_v3 = vclamps-f32 %v24_v1, 1.0  ;;  %s37_s14 = int_to_ptr.vmem [resolvable:$true] %s36_s14 }
  0x10   :  { %s74_s15 = scalar_lea.vmem %s37_s14, 256  ;;  %p79_p6 = scmp.lt.s32.totalorder %s37_s14, %s37_s14 }
  0x11   :  { %29 = vst [vmem:[#allocation5] sm:$0xff] %v48_v2  ;;  %30 = vst [vmem:[#allocation5 + $0x8] sm:$0xff] %v49_v3  ;;  %p75_p5 = scmp.ne.s32.totalorder %s37_s14, %s74_s15  ;;  %p80_p7 = scmp.lt.s32.totalorder %s74_s15, %s74_s15 }
  0x13   :  { %p81_p8 = por %p80_p7, %p79_p6 }
  0x15   :  { %p82_p9 = pnand %p81_p8, %p75_p5 }
  0x17   :  { %85 = shalt.err (!%p82_p9)
}
  0x18   :  { %42 = dma.vmem_to_hbm [thread:$0]  %s37_s14, 256, %s119_s1, [#allocation4], %s99_s9, %s99_s9, %s100_s10  }
  0x19   :  { %96 = dma.done.wait [#allocation4], 256  }
  0x1a   :  { %97 = vsyncadd [#allocation4], 4294967040 }
  0x1b   :  { %46 = vsyncpa [#allocation3], 1 }
  0x1c   :  { %47 = vsyncpa [#allocation4], 1 }

</bundles_post_ra>
